<compile_context>
chip_gen: v7x
topology: tpu7x:2x2x1
jax: 0.10.0
libtpu: 0.0.40
codegen_flags: <defaults>
</compile_context>

<pallas_src>
import functools

import jax
import jax.numpy as jnp
from jax.experimental import pallas as pl
from jax.experimental.pallas import tpu as pltpu

LANE = 128


# ----------------------------------------------------------------------------------
# helpers
# ----------------------------------------------------------------------------------
def _leaky(x, slope):
    return jnp.where(x >= 0, x, x * slope)


def _round_up(n, m):
    return (n + m - 1) // m * m


def _full_spec(shape):
    """BlockSpec covering the whole (small) array, replicated across the batch grid."""
    return pl.BlockSpec(shape, lambda b: (0,) * len(shape))


def _pad_conv_w(w, cin_p, cout_p):
    """(K, Cin, Cout) -> lane-padded im2col layout (K*cin_p, cout_p), bf16."""
    K, ci, co = w.shape
    w = jnp.pad(w, ((0, 0), (0, cin_p - ci), (0, cout_p - co)))
    return w.reshape(K * cin_p, cout_p).astype(jnp.bfloat16)


def _pad_bias(b, c_p):
    return jnp.pad(b, (0, c_p - b.shape[0])).reshape(1, c_p).astype(jnp.float32)


def _conv_im2col(x_pad, w_ref, b_ref, *, K, dil, pad, lpad, T):
    """Dilated 'same' Conv1d as one MXU matmul.

    x_pad : (Tpad, Cp) f32 value with zero halos (activation already applied).
    w_ref : (K*Cp, Co_p) bf16 ref, b_ref : (1, Co_p) f32 ref.
    Returns (T, Co_p) f32.
    """
    xb = x_pad.astype(jnp.bfloat16)
    cols = []
    for k in range(K):
        start = lpad - pad + k * dil          # static
        cols.append(xb[start:start + T, :])
    im2col = jnp.concatenate(cols, axis=-1) if K > 1 else cols[0]   # (T, K*Cp), 128-aligned pieces
    acc = jnp.dot(im2col, w_ref[...], preferred_element_type=jnp.float32)
    return acc + b_ref[...]


# ----------------------------------------------------------------------------------
# AR encoder kernel (fc1 -> leaky -> fc2 fused into one call)
# ----------------------------------------------------------------------------------
def _ar_mlp_kernel(ar_ref, w1_ref, b1_ref, w2_ref, b2_ref, o_ref, *, slope):
    h = jnp.dot(ar_ref[...].astype(jnp.bfloat16), w1_ref[...],
                preferred_element_type=jnp.float32) + b1_ref[...]
    h = _leaky(h, slope)
    o = jnp.dot(h.astype(jnp.bfloat16), w2_ref[...],
                preferred_element_type=jnp.float32) + b2_ref[...]
    o_ref[...] = o.astype(o_ref.dtype)


def _ar_mlp(ar, w1, b1, w2, b2, *, slope):
    B, fin = ar.shape
    fh, fo = w1.shape[1], w2.shape[1]
    return pl.pallas_call(
        functools.partial(_ar_mlp_kernel, slope=slope),
        out_shape=jax.ShapeDtypeStruct((B, fo), jnp.float32),
        grid=(1,),
        in_specs=[pl.BlockSpec((B, fin), lambda i: (0, 0)),
                  pl.BlockSpec((fin, fh), lambda i: (0, 0)),
                  pl.BlockSpec((1, fh), lambda i: (0, 0)),
                  pl.BlockSpec((fh, fo), lambda i: (0, 0)),
                  pl.BlockSpec((1, fo), lambda i: (0, 0))],
        out_specs=pl.BlockSpec((B, fo), lambda i: (0, 0)),
    )(ar, w1.astype(jnp.bfloat16), b1.reshape(1, fh).astype(jnp.float32),
      w2.astype(jnp.bfloat16), b2.reshape(1, fo).astype(jnp.float32))


# ----------------------------------------------------------------------------------
# Fused main kernel: input_conv -> MRF residual blocks -> average -> output_conv
# ----------------------------------------------------------------------------------
def _hifigan_kernel(*refs, block_defs, num_stages, nb, k0, slope, T, lpad):
    it = iter(refs)
    x_ref = next(it)                          # (1, T, CIN_P) channel-padded concat(x, ar_rep)
    in_w, in_b = next(it), next(it)
    blocks = []
    for ks, dils in block_defs:
        convs = [(next(it), next(it), next(it), next(it)) for _ in dils]
        blocks.append((ks, dils, convs))
    out_w, out_b = next(it), next(it)
    o_ref = next(it)                          # (1, T, COUT_P) lane-dense output
    buf_in, buf_a, buf_b, x0_buf, cs_buf = next(it), next(it), next(it), next(it), next(it)

    pad0 = (k0 - 1) // 2

    # Zero the padded scratch buffers once: halos must be zero and stay zero
    # (all later writes only touch rows [lpad, lpad+T); leaky(0)=0 keeps them valid).
    buf_in[...] = jnp.zeros_like(buf_in)
    buf_a[...] = jnp.zeros_like(buf_a)
    buf_b[...] = jnp.zeros_like(buf_b)

    # Stage the concatenated, channel-padded input into the zero-halo buffer.
    buf_in[lpad:lpad + T, :] = x_ref[0]

    # input_conv (no pre-activation).
    x0_buf[...] = _conv_im2col(buf_in[...], in_w, in_b,
                               K=k0, dil=1, pad=pad0, lpad=lpad, T=T)

    # MRF residual blocks — activations stay resident in VMEM.
    bidx = 0
    for _stage in range(num_stages):          # forward() never applies upsamples
        cs_buf[...] = jnp.zeros_like(cs_buf)
        for _j in range(nb):
            ks, dils, convs = blocks[bidx]
            bidx += 1
            half = (ks - 1) // 2
            buf_a[lpad:lpad + T, :] = x0_buf[...]
            for (c1_w, c1_b, c2_w, c2_b), d in zip(convs, dils):
                # xt = convs1[idx](leaky(x));  x = convs2[idx](leaky(xt)) + x
                xt = _conv_im2col(_leaky(buf_a[...], slope), c1_w, c1_b,
                                  K=ks, dil=d, pad=half * d, lpad=lpad, T=T)
                buf_b[lpad:lpad + T, :] = xt
                x_new = _conv_im2col(_leaky(buf_b[...], slope), c2_w, c2_b,
                                     K=ks, dil=1, pad=half, lpad=lpad, T=T)
                buf_a[lpad:lpad + T, :] = x_new + buf_a[lpad:lpad + T, :]
            cs_buf[...] = cs_buf[...] + buf_a[lpad:lpad + T, :]
        x0_buf[...] = cs_buf[...] * (1.0 / nb)

    # output_conv: LeakyReLU (PyTorch default slope 0.01) -> Conv1d, lane-dense store.
    buf_a[lpad:lpad + T, :] = x0_buf[...]
    out = _conv_im2col(_leaky(buf_a[...], 0.01), out_w, out_b,
                       K=k0, dil=1, pad=pad0, lpad=lpad, T=T)
    o_ref[0] = out.astype(o_ref.dtype)


# ----------------------------------------------------------------------------------
# Parameters (deterministic synthetic init, mirroring reset_parameters: N(0, 0.01))
# ----------------------------------------------------------------------------------
def init_params(key, cfg):
    counter = [0]

    def nrm(shape, scale=0.01):
        counter[0] += 1
        return scale * jax.random.normal(jax.random.fold_in(key, counter[0]),
                                         shape, jnp.float32)

    def zeros(shape):
        return jnp.zeros(shape, jnp.float32)

    C = cfg["channels"]
    k = cfg["kernel_size"]
    p = {}

    # AR encoder (PastFCEncoder).
    # TODO(synk): PastFCEncoder internals not given; assumed Linear -> LeakyReLU -> Linear MLP.
    p["ar_fc1_w"] = nrm((cfg["ar_input"], cfg["ar_hidden"]), 0.05)
    p["ar_fc1_b"] = zeros((cfg["ar_hidden"],))
    p["ar_fc2_w"] = nrm((cfg["ar_hidden"], cfg["ar_output"]), 0.05)
    p["ar_fc2_b"] = zeros((cfg["ar_output"],))

    # input_conv: Conv1d(in_channels + ar_output, channels // 2, k, padding='same')
    cin = cfg["in_channels"] + cfg["ar_output"]
    p["in_w"] = nrm((k, cin, C // 2))
    p["in_b"] = zeros((C // 2,))

    # Residual blocks (self.upsamples is never applied in forward -> omitted).
    blocks = []
    for i in range(cfg["num_upsamples"]):
        ch = C // 2 ** (i + 1)
        for ks, dils in zip(cfg["resblock_kernel_sizes"], cfg["resblock_dilations"]):
            bp = {"c1_w": [], "c1_b": [], "c2_w": [], "c2_b": []}
            for _d in dils:
                bp["c1_w"].append(nrm((ks, ch, ch)))
                bp["c1_b"].append(zeros((ch,)))
                bp["c2_w"].append(nrm((ks, ch, ch)))   # use_additional_convs=True
                bp["c2_b"].append(zeros((ch,)))
            blocks.append(bp)
    p["blocks"] = blocks

    # output_conv: LeakyReLU() -> Conv1d(ch_last, out_channels, k) (use_tanh=False)
    ch_last = C // 2 ** cfg["num_upsamples"]
    p["out_w"] = nrm((k, ch_last, cfg["out_channels"]))
    p["out_b"] = zeros((cfg["out_channels"],))
    return p


# ----------------------------------------------------------------------------------
# Forward pass (matches HiFiGANGenerator.forward semantics)
# ----------------------------------------------------------------------------------
def hifigan_forward(params, x_ncl, ar, cfg):
    """x_ncl: (B, in_channels, T) NCL; ar: (B, ar_input). Returns (B, out_channels, T)."""
    # forward() never applies self.upsamples, so it is only shape-consistent for 1 stage.
    assert cfg["num_upsamples"] == 1, "HiFiGANGenerator.forward is only consistent for num_upsamples=1"

    slope = cfg["negative_slope"]
    k0 = cfg["kernel_size"]
    B, _, T = x_ncl.shape
    C2 = cfg["channels"] // 2
    nb = len(cfg["resblock_kernel_sizes"])

    CP = _round_up(C2, LANE)                                  # internal channel width
    CIN = cfg["in_channels"] + cfg["ar_output"]
    CIN_P = _round_up(CIN, LANE)
    COUT_P = _round_up(cfg["out_channels"], LANE)

    # ---- AR encoder: fused fc1 -> leaky -> fc2 (one tiny pallas_call) -------------
    ar_feats = _ar_mlp(ar.astype(jnp.float32),
                       params["ar_fc1_w"], params["ar_fc1_b"],
                       params["ar_fc2_w"], params["ar_fc2_b"], slope=slope)   # (B, ar_output)

    # ---- channels-last input, broadcast ar over time, concat, lane-pad once -------
    x = jnp.transpose(x_ncl, (0, 2, 1)).astype(jnp.float32)                    # (B, T, Cin)
    ar_rep = jnp.broadcast_to(ar_feats[:, None, :], (B, T, cfg["ar_output"]))
    x_cat = jnp.concatenate([x, ar_rep], axis=-1)
    x_cat = jnp.pad(x_cat, ((0, 0), (0, 0), (0, CIN_P - CIN)))                 # lane-dense

    # ---- halo sizing + static block structure --------------------------------------
    pads = [(k0 - 1) // 2]
    block_defs = []
    for _i in range(cfg["num_upsamples"]):
        for ks, dils in zip(cfg["resblock_kernel_sizes"], cfg["resblock_dilations"]):
            block_defs.append((ks, tuple(dils)))
            for d in dils:
                pads.append((ks - 1) // 2 * d)
    maxpad = max(pads)
    lpad = _round_up(maxpad, 8)                 # 8-aligned left halo -> aligned middle writes
    tpad = lpad + T + _round_up(maxpad, 8)

    # ---- pack weights: im2col layout, bf16, zero-padded to lane-dense channels -----
    inputs = [x_cat,
              _pad_conv_w(params["in_w"], CIN_P, CP), _pad_bias(params["in_b"], CP)]
    in_specs = [pl.BlockSpec((1, T, CIN_P), lambda b: (b, 0, 0)),
                _full_spec((k0 * CIN_P, CP)), _full_spec((1, CP))]
    bi = 0
    for _i in range(cfg["num_upsamples"]):
        for ks, dils in zip(cfg["resblock_kernel_sizes"], cfg["resblock_dilations"]):
            bp = params["blocks"][bi]
            bi += 1
            for idx in range(len(dils)):
                for w, b_ in ((bp["c1_w"][idx], bp["c1_b"][idx]),
                              (bp["c2_w"][idx], bp["c2_b"][idx])):
                    inputs += [_pad_conv_w(w, CP, CP), _pad_bias(b_, CP)]
                    in_specs += [_full_spec((ks * CP, CP)), _full_spec((1, CP))]
    inputs += [_pad_conv_w(params["out_w"], CP, COUT_P), _pad_bias(params["out_b"], COUT_P)]
    in_specs += [_full_spec((k0 * CP, COUT_P)), _full_spec((1, COUT_P))]

    kern = functools.partial(_hifigan_kernel,
                             block_defs=tuple(block_defs),
                             num_stages=cfg["num_upsamples"], nb=nb,
                             k0=k0, slope=slope, T=T, lpad=lpad)

    out_padded = pl.pallas_call(
        kern,
        out_shape=jax.ShapeDtypeStruct((B, T, COUT_P), jnp.float32),
        grid=(B,),
        in_specs=in_specs,
        out_specs=pl.BlockSpec((1, T, COUT_P), lambda b: (b, 0, 0)),
        scratch_shapes=[
            pltpu.VMEM((tpad, CIN_P), jnp.float32),   # buf_in : padded concat input
            pltpu.VMEM((tpad, CP), jnp.float32),      # buf_a  : padded working activation
            pltpu.VMEM((tpad, CP), jnp.float32),      # buf_b  : padded intermediate xt
            pltpu.VMEM((T, CP), jnp.float32),         # x0_buf : block input / stage carry
            pltpu.VMEM((T, CP), jnp.float32),         # cs_buf : MRF accumulator
        ],
        compiler_params=pltpu.CompilerParams(dimension_semantics=("parallel",)),
    )(*inputs)

    out = out_padded[:, :, :cfg["out_channels"]]
    return jnp.transpose(out, (0, 2, 1))               # back to NCL (B, out_channels, T)


# ----------------------------------------------------------------------------------
# Pure-JAX reference (f32) for correctness checking
# ----------------------------------------------------------------------------------
def _reference_forward(params, x_ncl, ar, cfg):
    slope = cfg["negative_slope"]
    nb = len(cfg["resblock_kernel_sizes"])

    def conv(v, w, b, dil=1):                   # v: (B,T,Cin), w: (K,Cin,Cout)
        K = w.shape[0]
        p = (K - 1) // 2 * dil
        vp = jnp.pad(v, ((0, 0), (p, p), (0, 0)))
        T = v.shape[1]
        acc = jnp.zeros((v.shape[0], T, w.shape[2]), jnp.float32)
        for k in range(K):
            acc = acc + jnp.einsum("btc,cd->btd", vp[:, k * dil:k * dil + T, :], w[k])
        return acc + b

    x = jnp.transpose(x_ncl, (0, 2, 1)).astype(jnp.float32)
    B, T, _ = x.shape
    h = _leaky(ar @ params["ar_fc1_w"] + params["ar_fc1_b"], slope)
    ar_feats = h @ params["ar_fc2_w"] + params["ar_fc2_b"]
    ar_rep = jnp.broadcast_to(ar_feats[:, None, :], (B, T, ar_feats.shape[-1]))
    v = conv(jnp.concatenate([x, ar_rep], axis=-1), params["in_w"], params["in_b"])
    bi = 0
    for _i in range(cfg["num_upsamples"]):
        cs = None
        for _j, dils in zip(cfg["resblock_kernel_sizes"], cfg["resblock_dilations"]):
            bp = params["blocks"][bi]
            bi += 1
            xb = v
            for idx, d in enumerate(dils):
                xt = conv(_leaky(xb, slope), bp["c1_w"][idx], bp["c1_b"][idx], dil=d)
                xt = conv(_leaky(xt, slope), bp["c2_w"][idx], bp["c2_b"][idx], dil=1)
                xb = xt + xb
            cs = xb if cs is None else cs + xb
        v = cs / nb
    out = conv(_leaky(v, 0.01), params["out_w"], params["out_b"])
    return jnp.transpose(out, (0, 2, 1))


# ----------------------------------------------------------------------------------
if __name__ == "__main__":
    cfg = dict(
        in_channels=16,
        out_channels=1,
        channels=32,
        kernel_size=3,
        num_upsamples=1,                       # upsample_scales=(2,)
        resblock_kernel_sizes=(3, 7),
        resblock_dilations=((1, 3), (1, 3)),
        ar_input=24,
        ar_hidden=16,
        ar_output=8,
        negative_slope=0.1,
    )
    B, T = 2, 64

    key = jax.random.PRNGKey(0)
    params = init_params(key, cfg)

    kx, kar = jax.random.split(jax.random.fold_in(key, 1000))
    x = jax.random.normal(kx, (B, cfg["in_channels"], T), jnp.float32)
    ar = jax.random.normal(kar, (B, cfg["ar_input"]), jnp.float32)

    out = hifigan_forward(params, x, ar, cfg)
    out = jax.block_until_ready(out)

    assert out.shape == (B, cfg["out_channels"], T), out.shape
    assert out.dtype == jnp.float32
    assert bool(jnp.all(jnp.isfinite(out)))

    ref = _reference_forward(params, x, ar, cfg)
    err = float(jnp.max(jnp.abs(out - ref)) / (jnp.max(jnp.abs(ref)) + 1e-8))
    assert err < 5e-2, f"mismatch vs f32 reference (normalized max err = {err})"

    print("KERNEL_OK")
</pallas_src>

<mosaic_0001>
module attributes {stable_mosaic.version = 11 : i64} {
  func.func @_ar_mlp_kernel(%arg0: i32, %arg1: memref<2x24xf32, #tpu.memory_space<vmem>>, %arg2: memref<24x16xbf16, #tpu.memory_space<vmem>>, %arg3: memref<1x16xf32, #tpu.memory_space<vmem>>, %arg4: memref<16x8xbf16, #tpu.memory_space<vmem>>, %arg5: memref<1x8xf32, #tpu.memory_space<vmem>>, %arg6: memref<2x8xf32, #tpu.memory_space<vmem>>) attributes {dimension_semantics = [#tpu.dimension_semantics<arbitrary>], iteration_bounds = array<i64: 1>, scalar_prefetch = 0 : i64, scratch_operands = 0 : i64, tpu.core_type = #tpu.core_type<tc>, window_params = [{pipeline_mode = #tpu.pipeline_mode<synchronous>, transform_indices = @transform_0, window_bounds = array<i64: 2, 24>}, {pipeline_mode = #tpu.pipeline_mode<synchronous>, transform_indices = @transform_1, window_bounds = array<i64: 24, 16>}, {pipeline_mode = #tpu.pipeline_mode<synchronous>, transform_indices = @transform_2, window_bounds = array<i64: 1, 16>}, {pipeline_mode = #tpu.pipeline_mode<synchronous>, transform_indices = @transform_3, window_bounds = array<i64: 16, 8>}, {pipeline_mode = #tpu.pipeline_mode<synchronous>, transform_indices = @transform_4, window_bounds = array<i64: 1, 8>}, {pipeline_mode = #tpu.pipeline_mode<synchronous>, transform_indices = @transform_5, window_bounds = array<i64: 2, 8>}]} {
    %c0 = arith.constant 0 : index
    %c0_0 = arith.constant 0 : index
    %0 = vector.load %arg1[%c0, %c0_0] : memref<2x24xf32, #tpu.memory_space<vmem>>, vector<2x24xf32>
    %1 = arith.truncf %0 : vector<2x24xf32> to vector<2x24xbf16>
    %c0_1 = arith.constant 0 : index
    %c0_2 = arith.constant 0 : index
    %2 = vector.load %arg2[%c0_1, %c0_2] : memref<24x16xbf16, #tpu.memory_space<vmem>>, vector<24x16xbf16>
    %cst = arith.constant dense<0.000000e+00> : vector<2x16xf32>
    %3 = tpu.matmul %1, %2, %cst {dimension_numbers = #tpu.dot_dimension_numbers<[1], [0], [0], [1], [0, 0, 1, 1], [], []>} : vector<2x24xbf16>, vector<24x16xbf16>, vector<2x16xf32> -> vector<2x16xf32>
    %c0_3 = arith.constant 0 : index
    %c0_4 = arith.constant 0 : index
    %4 = vector.load %arg3[%c0_3, %c0_4] : memref<1x16xf32, #tpu.memory_space<vmem>>, vector<1x16xf32>
    %5 = vector.broadcast %4 : vector<1x16xf32> to vector<2x16xf32>
    %6 = arith.addf %3, %5 : vector<2x16xf32>
    %cst_5 = arith.constant 0.000000e+00 : f32
    %7 = vector.broadcast %cst_5 : f32 to vector<2x16xf32>
    %8 = arith.cmpf oge, %6, %7 : vector<2x16xf32>
    %cst_6 = arith.constant 1.000000e-01 : f32
    %9 = vector.broadcast %cst_6 : f32 to vector<2x16xf32>
    %10 = arith.mulf %6, %9 : vector<2x16xf32>
    %11 = arith.select %8, %6, %10 : vector<2x16xi1>, vector<2x16xf32>
    %12 = arith.truncf %11 : vector<2x16xf32> to vector<2x16xbf16>
    %c0_7 = arith.constant 0 : index
    %c0_8 = arith.constant 0 : index
    %13 = vector.load %arg4[%c0_7, %c0_8] : memref<16x8xbf16, #tpu.memory_space<vmem>>, vector<16x8xbf16>
    %cst_9 = arith.constant dense<0.000000e+00> : vector<2x8xf32>
    %14 = tpu.matmul %12, %13, %cst_9 {dimension_numbers = #tpu.dot_dimension_numbers<[1], [0], [0], [1], [0, 0, 1, 1], [], []>} : vector<2x16xbf16>, vector<16x8xbf16>, vector<2x8xf32> -> vector<2x8xf32>
    %c0_10 = arith.constant 0 : index
    %c0_11 = arith.constant 0 : index
    %15 = vector.load %arg5[%c0_10, %c0_11] : memref<1x8xf32, #tpu.memory_space<vmem>>, vector<1x8xf32>
    %16 = vector.broadcast %15 : vector<1x8xf32> to vector<2x8xf32>
    %17 = arith.addf %14, %16 : vector<2x8xf32>
    %c0_12 = arith.constant 0 : index
    %c0_13 = arith.constant 0 : index
    %18 = vector.load %arg6[%c0_12, %c0_13] : memref<2x8xf32, #tpu.memory_space<vmem>>, vector<2x8xf32>
    tpu.vector_store %arg6[%c0_12, %c0_13], %17 {strides = array<i32>} : memref<2x8xf32, #tpu.memory_space<vmem>>, vector<2x8xf32>,
    return
  }
  func.func @transform_0(%arg0: i32) -> (i32, i32) {
    %c0_i32 = arith.constant 0 : i32
    %c0_i32_0 = arith.constant 0 : i32
    %c0_i32_1 = arith.constant 0 : i32
    return %c0_i32, %c0_i32_0 : i32, i32
  }
  func.func @transform_1(%arg0: i32) -> (i32, i32) {
    %c0_i32 = arith.constant 0 : i32
    %c0_i32_0 = arith.constant 0 : i32
    %c0_i32_1 = arith.constant 0 : i32
    return %c0_i32, %c0_i32_0 : i32, i32
  }
  func.func @transform_2(%arg0: i32) -> (i32, i32) {
    %c0_i32 = arith.constant 0 : i32
    %c0_i32_0 = arith.constant 0 : i32
    %c0_i32_1 = arith.constant 0 : i32
    return %c0_i32, %c0_i32_0 : i32, i32
  }
  func.func @transform_3(%arg0: i32) -> (i32, i32) {
    %c0_i32 = arith.constant 0 : i32
    %c0_i32_0 = arith.constant 0 : i32
    %c0_i32_1 = arith.constant 0 : i32
    return %c0_i32, %c0_i32_0 : i32, i32
  }
  func.func @transform_4(%arg0: i32) -> (i32, i32) {
    %c0_i32 = arith.constant 0 : i32
    %c0_i32_0 = arith.constant 0 : i32
    %c0_i32_1 = arith.constant 0 : i32
    return %c0_i32, %c0_i32_0 : i32, i32
  }
  func.func @transform_5(%arg0: i32) -> (i32, i32) {
    %c0_i32 = arith.constant 0 : i32
    %c0_i32_0 = arith.constant 0 : i32
    %c0_i32_1 = arith.constant 0 : i32
    return %c0_i32, %c0_i32_0 : i32, i32
  }
}

</mosaic_0001>

<bundles_post_ra>
// kernel: tpu_custom_call.1
= control target key start
LH: loop header
LB: loop body
LE: loop exit
PB: predicated region body
PF: predicated region fallthrough
CT: control target
= control target key end

     0   :  { %v226_v1 = vmov 0.0   ;;  %vm47_vm0 = vcmask 1043456   ;;  %vm227_vm1 = vmmov 0   ;;  %s289_s0 = inlined_call_operand.vmem [shape: f32[2,24], index: 0, kind: input, shape index: {}]   ;;  %s290_s1 = inlined_call_operand.vmem [shape: bf16[24,16], index: 1, kind: input, shape index: {}]   ;;  %s291_s2 = inlined_call_operand.vmem [shape: f32[1,16], index: 2, kind: input, shape index: {}]   ;;  %s292_s3 = inlined_call_operand.vmem [shape: bf16[16,8], index: 3, kind: input, shape index: {}]   ;;  %s293_s4 = inlined_call_operand.vmem [shape: f32[1,8], index: 4, kind: input, shape index: {}]   ;;  %s294_s5 = inlined_call_operand.hbm [shape: f32[2,8], index: 5, kind: output, shape index: {}]  }
   0x1   :  { %v199_v0 = vld [vmem:[%s290_s1] sm:$0xff]   ;;  %182 = vmatprep.subr.bf16.mxu0 %v226_v1  ;;  %v200_v2 = vld [vmem:[%s290_s1 + $0x8] ss:$0 sps:$4 sm:$0xff]   ;;  %190 = vmatprep.subr.bf16.mxu1 %v226_v1 }
   0x2   :  { %183 = vmatpush3.bf16.msra.mxu0 %v199_v0  ;;  %186 = vmatprep.mubr.msk.bf16.mxu0 %vm227_vm1, %v226_v1  ;;  %v22_v3 = vld [vmem:[%s289_s0] sm:$0x3]  ;;  %v49_v4 = vsel %vm47_vm0, %v200_v2, 0 }
   0x3   :  { %184 = vmatprep.subr.bf16.mxu0 %v226_v1  ;;  %192 = vmatprep.mubr.msk.bf16.mxu1 %vm227_vm1, %v226_v1 }
   0x4   :  { %10 = vsyncpa [#allocation3], 0  ;;  %v23_v5 = vpack.c.bf16 %v22_v3, %v22_v3  ;;  %vm43_vm2 = vcmask 195584   ;;  %v201_v6 = vld [vmem:[%s292_s3] sm:$0xff]   ;;  %vm110_vm4 = vcmask 130048   ;;  %s228_s3 = smov [#allocation2]  }
   0x5   :  { %191 = vmatpush3.bf16.msra.mxu1 %v201_v6  ;;  %v170_v7 = vld [vmem:[%s291_s2] ss:$0 sm:$0xff]  ;;  %s162_s28 = sshll.u32 %s228_s3, 4  ;;  %vm154_vm5 = vcmask 58368   ;;  %s163_s28 = int_to_ptr.vmem [resolvable:$true] %s162_s28 }
   0x6   :  { %185 = vmatpush3.bf16.msra.mxu0 %v49_v4  ;;  %v174_v16 = vld [vmem:[%s293_s4] ss:$0 sm:$0xff]  ;;  %s202_s2 = scalar_lea.vmem %s163_s28, 32  ;;  %p207_p1 = scmp.lt.s32.totalorder %s163_s28, %s163_s28 }
   0x7   :  { %p203_p0 = scmp.ne.s32.totalorder %s163_s28, %s202_s2  ;;  %p208_p2 = scmp.lt.s32.totalorder %s202_s2, %s202_s2 }
   0x9   :  { %187 = vmatmul.mubr.msk.bf16.vlgmr.msra.gmra.mrb[0].mxu0 %vm43_vm2, %v23_v5  ;;  %p209_p3 = por %p208_p2, %p207_p1 }
   0xb   :  { %p210_p4 = pnand %p209_p3, %p203_p0 }
  0xdc   :  { %v85_v8 = vpop.f32.mrb[0].mxu0 }
  0xdd   :  { %v86_v9 = vadd.f32 %v170_v7, %v85_v8  ;;  %v188_v10 = vpop.f32.mrb[1].mxu0 }
  0xde   :  { %v88_v11 = vpop.f32.mrb[2].mxu0 }
  0xdf   :  { %vm91_vm3 = vcmp.ge.f32.partialorder %v86_v9, 0.0  ;;  %v92_v12 = vmul.f32 0.1, %v86_v9  ;;  %v189_v13 = vpop.f32.mrb[3].mxu0 }
  0xe1   :  { %v93_v14 = vsel %vm91_vm3, %v86_v9, %v92_v12 }
  0xe2   :  { %v94_v15 = vpack.c.bf16 %v93_v14, %v93_v14 }
  0xe4   :  { %193 = vmatmul.mubr.msk.bf16.vlgmr.msra.gmra.mrb[0].mxu1 %vm110_vm4, %v94_v15 }
 0x1b7   :  { %v148_v17 = vpop.f32.mrb[0].mxu1 }
 0x1b8   :  { %v149_v18 = vadd.f32 %v174_v16, %v148_v17  ;;  %v194_v19 = vpop.f32.mrb[1].mxu1 }
 0x1b9   :  { %v151_v20 = vpop.f32.mrb[2].mxu1 }
 0x1ba   :  { %v195_v21 = vpop.f32.mrb[3].mxu1  ;;  %155 = vst.msk [vmem:[#allocation2] sm:$0x3] %vm154_vm5, %v149_v18 }
 0x1bb   :  { %213 = shalt.err (!%p210_p4)
}
 0x1bc   :  { %s214_s4 = scalar_lea.hbm %s294_s5, 32 }
 0x1bd   :  { %p215_p5 = scmp.ne.s32.totalorder %s294_s5, %s214_s4  ;;  %p218_p6 = scmp.lt.u32.totalorder %s214_s4, %s294_s5 }
 0x1bf   :  { %p220_p7 = pnand %p218_p6, %p215_p5 }
 0x1c1   :  { %223 = shalt.err (!%p220_p7)
}
 0x1c2   :  { %165 = dma.vmem_to_hbm [thread:$0]  %s163_s28, 32, %s294_s5, [#allocation3]  }
 0x1c3   :  { %224 = dma.done.wait [#allocation3], 32  }
 0x1c4   :  { %225 = vsyncadd [#allocation3], 4294967264 }
 0x1c5   :  { %169 = vsyncpa [#allocation3], 1 }

</bundles_post_ra>
